<compile_context>
chip_gen: v7x
topology: tpu7x:2x2x1
jax: 0.10.0
libtpu: 0.0.40
codegen_flags: <defaults>
</compile_context>

<pallas_src>
import math
import functools

import jax
import jax.numpy as jnp
from jax.experimental import pallas as pl
from jax.experimental.pallas import tpu as pltpu


# ----------------------------------------------------------------------------
# Generation-aware tiling / VMEM budget
# ----------------------------------------------------------------------------
@functools.lru_cache(maxsize=None)
def _budget():
    vmem_bytes = 64 * 1024 * 1024
    try:
        info = pltpu.get_tpu_info()
        vmem_bytes = int(getattr(info, "vmem_capacity_bytes", vmem_bytes))
    except Exception:
        pass
    if vmem_bytes >= 100 * 1024 * 1024:
        # v5e / v6e class (128 MiB physical VMEM): larger tiles amortize the
        # per-grid-step overhead and fill the MXU M dimension.
        return {"vmem_limit": 96 * 1024 * 1024,
                "m_tile": 512, "n_tile": 1024, "q_tile": 256}
    # v7x class (64 MiB physical VMEM): keep per-step residency small.
    return {"vmem_limit": 48 * 1024 * 1024,
            "m_tile": 256, "n_tile": 512, "q_tile": 128}


def _pick_tile(dim, max_tile):
    # Full extent if it fits in one tile (always a legal block shape);
    # otherwise the budgeted tile (multiple of 8 / 128) and Pallas masks the
    # trailing partial block.
    return dim if dim <= max_tile else max_tile


# ----------------------------------------------------------------------------
# Kernel 1: tiled linear  y = x @ W_t + b   (W_t pre-transposed to [in, out])
# Grid is (N outer, M inner) so the weight block is reused across M steps.
# ----------------------------------------------------------------------------
def _linear_kernel(x_ref, w_ref, b_ref, o_ref):
    # Cast activations in VMEM (avoids an extra XLA bf16-copy pass in HBM).
    x = x_ref[...].astype(w_ref.dtype)
    y = jnp.dot(x, w_ref[...], preferred_element_type=jnp.float32)
    o_ref[...] = (y + b_ref[...]).astype(o_ref.dtype)


def linear(x2d, w_t, b2d, out_dtype=None):
    M, in_dim = x2d.shape
    out_dim = w_t.shape[1]
    out_dtype = x2d.dtype if out_dtype is None else out_dtype
    bud = _budget()
    tm = _pick_tile(M, bud["m_tile"])
    tn = _pick_tile(out_dim, bud["n_tile"])
    return pl.pallas_call(
        _linear_kernel,
        out_shape=jax.ShapeDtypeStruct((M, out_dim), out_dtype),
        grid=(pl.cdiv(out_dim, tn), pl.cdiv(M, tm)),
        in_specs=[
            pl.BlockSpec((tm, in_dim), lambda n, m: (m, 0)),
            pl.BlockSpec((in_dim, tn), lambda n, m: (0, n)),
            pl.BlockSpec((1, tn), lambda n, m: (0, n)),
        ],
        out_specs=pl.BlockSpec((tm, tn), lambda n, m: (m, n)),
        compiler_params=pltpu.CompilerParams(
            dimension_semantics=("parallel", "parallel"),
            vmem_limit_bytes=bud["vmem_limit"]),
    )(x2d, w_t, b2d)


# ----------------------------------------------------------------------------
# Kernel 2: scaled-dot-product attention, query-tiled, all heads per step.
# Reads Q/K/V in [B, L, hid] layout (head split in-kernel via lane slices),
# writes probs [B, H, Lq, Lk] and the already-head-merged ctx [B, Lq, hid].
# ----------------------------------------------------------------------------
def _attn_kernel(q_ref, k_ref, v_ref, bias_ref, attn_ref, ctx_ref, *,
                 n_heads, head_dim):
    q = q_ref[0]          # (tq, hid)  -- Wq already carries 1/sqrt(hid)
    k = k_ref[0]          # (Lk, hid)
    v = v_ref[0]          # (Lk, hid)
    bias = bias_ref[0]    # (1, Lk) additive f32 mask bias

    ctx_parts = []
    for h in range(n_heads):                      # static unroll over heads
        lo = h * head_dim
        qh = q[:, lo:lo + head_dim]
        kh = k[:, lo:lo + head_dim]
        vh = v[:, lo:lo + head_dim]
        # energy_h = q_h @ k_h^T, f32 accumulation on the MXU
        energy = jax.lax.dot_general(
            qh, kh, (((1,), (1,)), ((), ())),
            preferred_element_type=jnp.float32)
        energy = energy + bias                    # masked_fill as a single add
        # numerically-stable softmax along keys (all f32; exp/recip on EUP)
        e_max = jnp.max(energy, axis=-1, keepdims=True)
        p = jnp.exp(energy - e_max)
        denom = jnp.sum(p, axis=-1, keepdims=True)
        attn = p * pl.reciprocal(denom, approx=True)
        attn_ref[0, h] = attn.astype(attn_ref.dtype)
        # TODO(synk): training-mode dropout on `attn` before the V matmul is
        # not reproduced here (identity in eval mode).
        ctx_parts.append(
            jnp.dot(attn.astype(vh.dtype), vh,
                    preferred_element_type=jnp.float32))
    # Head merge fused in-kernel: one lane-dense (tq, hid) store.
    ctx_ref[0] = jnp.concatenate(ctx_parts, axis=-1).astype(ctx_ref.dtype)


def attention(q_arr, k_arr, v_arr, bias, *, n_heads, hid, Lq, Lk,
              q_col, k_col, v_col, attn_dtype):
    # q_arr/k_arr/v_arr: [B, L, *], the Q/K/V windows start at column block
    # q_col/k_col/v_col (0 for separate arrays; 0/1/2 for the stacked QKV).
    # TODO(synk): for very long Lk on 64-MiB parts a key-tiled (flash-style)
    # variant is needed; kept full-Lk here because the module returns the full
    # attention-prob tensor.
    B = q_arr.shape[0]
    head_dim = hid // n_heads
    bud = _budget()
    tq = _pick_tile(Lq, bud["q_tile"])
    kernel = functools.partial(_attn_kernel, n_heads=n_heads, head_dim=head_dim)
    attn, ctx = pl.pallas_call(
        kernel,
        out_shape=(
            jax.ShapeDtypeStruct((B, n_heads, Lq, Lk), attn_dtype),
            jax.ShapeDtypeStruct((B, Lq, hid), q_arr.dtype),
        ),
        grid=(B, pl.cdiv(Lq, tq)),
        in_specs=[
            pl.BlockSpec((1, tq, hid), lambda b, qi, c=q_col: (b, qi, c)),
            pl.BlockSpec((1, Lk, hid), lambda b, qi, c=k_col: (b, 0, c)),
            pl.BlockSpec((1, Lk, hid), lambda b, qi, c=v_col: (b, 0, c)),
            pl.BlockSpec((1, 1, Lk), lambda b, qi: (b, 0, 0)),
        ],
        out_specs=(
            pl.BlockSpec((1, n_heads, tq, Lk), lambda b, qi: (b, 0, qi, 0)),
            pl.BlockSpec((1, tq, hid), lambda b, qi: (b, qi, 0)),
        ),
        compiler_params=pltpu.CompilerParams(
            dimension_semantics=("parallel", "parallel"),
            vmem_limit_bytes=bud["vmem_limit"]),
    )(q_arr, k_arr, v_arr, bias)
    return attn, ctx


# ----------------------------------------------------------------------------
# Parameter prep (one-time, hoisted out of the forward)
# ----------------------------------------------------------------------------
def init_params(key, hid_dim, n_heads):
    """Raw parameters in the PyTorch nn.Linear layout (W: [out, in])."""
    keys = jax.random.split(key, 8)
    bound = 1.0 / math.sqrt(hid_dim)

    def u(k, shape):
        return jax.random.uniform(k, shape, jnp.float32, -bound, bound)

    return {
        "n_heads": n_heads,
        "wq": u(keys[0], (hid_dim, hid_dim)), "bq": u(keys[1], (hid_dim,)),
        "wk": u(keys[2], (hid_dim, hid_dim)), "bk": u(keys[3], (hid_dim,)),
        "wv": u(keys[4], (hid_dim, hid_dim)), "bv": u(keys[5], (hid_dim,)),
        "wo": u(keys[6], (hid_dim, hid_dim)), "bo": u(keys[7], (hid_dim,)),
    }


def prepare_params(raw, compute_dtype=jnp.bfloat16):
    """Transpose weights to [in, out], fold 1/sqrt(hid) into Wq/bq, cast to
    the MXU compute dtype and build the stacked QKV weight — done once."""
    hid = raw["wq"].shape[0]
    inv_scale = 1.0 / math.sqrt(float(hid))   # module scales by sqrt(hid_dim)
    wq_t = (raw["wq"].T * inv_scale).astype(compute_dtype)
    wk_t = raw["wk"].T.astype(compute_dtype)
    wv_t = raw["wv"].T.astype(compute_dtype)
    wo_t = raw["wo"].T.astype(compute_dtype)
    bq = (raw["bq"] * inv_scale).astype(jnp.float32)
    bk = raw["bk"].astype(jnp.float32)
    bv = raw["bv"].astype(jnp.float32)
    bo = raw["bo"].astype(jnp.float32)
    return {
        "n_heads": int(raw["n_heads"]),
        "hid_dim": hid,
        "wq_t": wq_t, "wk_t": wk_t, "wv_t": wv_t, "wo_t": wo_t,
        "bq": bq.reshape(1, hid), "bk": bk.reshape(1, hid),
        "bv": bv.reshape(1, hid), "bo": bo.reshape(1, hid),
        "w_qkv_t": jnp.concatenate([wq_t, wk_t, wv_t], axis=1),
        "b_qkv": jnp.concatenate([bq, bk, bv]).reshape(1, 3 * hid),
    }


# ----------------------------------------------------------------------------
# Module forward
# ----------------------------------------------------------------------------
def multi_head_attention(params, query, key, value, mask=None, attn_dtype=None):
    B, Lq, hid = query.shape
    Lk = key.shape[1]
    n_heads = params["n_heads"]
    in_dtype = query.dtype
    cdt = params["w_qkv_t"].dtype
    # Probs are returned in the input dtype by default (module semantics);
    # pass attn_dtype=jnp.bfloat16 to halve the dominant B*H*Lq*Lk writeback.
    attn_dtype = in_dtype if attn_dtype is None else attn_dtype

    # NOTE: identity check — equal-but-distinct q/k/v arrays take the
    # (numerically identical) separate-projection path.
    self_attn = (query is key) and (key is value)
    if self_attn and hid % 128 == 0:
        # Fused QKV: one launch, x read once, lane-dense [M, 3*hid] output that
        # the attention kernel reads directly via column-offset BlockSpecs.
        qkv = linear(query.reshape(-1, hid), params["w_qkv_t"],
                     params["b_qkv"], out_dtype=cdt).reshape(B, Lq, 3 * hid)
        q_arr = k_arr = v_arr = qkv
        q_col, k_col, v_col = 0, 1, 2
    else:
        q_arr = linear(query.reshape(-1, hid), params["wq_t"], params["bq"],
                       out_dtype=cdt).reshape(B, Lq, hid)
        k_arr = linear(key.reshape(-1, hid), params["wk_t"], params["bk"],
                       out_dtype=cdt).reshape(B, Lk, hid)
        v_arr = linear(value.reshape(-1, hid), params["wv_t"], params["bv"],
                       out_dtype=cdt).reshape(B, Lk, hid)
        q_col = k_col = v_col = 0

    if mask is None:
        bias = jnp.zeros((B, 1, Lk), jnp.float32)
    else:
        bias = jnp.where(mask.reshape(B, 1, Lk) == 0,
                         jnp.float32(-10000000000.0), jnp.float32(0.0))

    attn, ctx = attention(q_arr, k_arr, v_arr, bias,
                          n_heads=n_heads, hid=hid, Lq=Lq, Lk=Lk,
                          q_col=q_col, k_col=k_col, v_col=v_col,
                          attn_dtype=attn_dtype)

    # ctx is already head-merged [B, Lq, hid] — straight into the output proj.
    out = linear(ctx.reshape(B * Lq, hid), params["wo_t"], params["bo"],
                 out_dtype=in_dtype).reshape(B, Lq, hid)
    return out, attn


# ----------------------------------------------------------------------------
# Pure-JAX reference (f32, mirrors the PyTorch module in eval mode)
# ----------------------------------------------------------------------------
def _reference(raw, query, key, value, mask, n_heads):
    hid = query.shape[-1]
    B, Lq, _ = query.shape
    Lk = key.shape[1]
    Dh = hid // n_heads

    def lin(x, w, b):
        return x @ w.T + b

    def split(x, L):
        return x.reshape(B, L, n_heads, Dh).transpose(0, 2, 1, 3)

    Qh = split(lin(query, raw["wq"], raw["bq"]), Lq)
    Kh = split(lin(key, raw["wk"], raw["bk"]), Lk)
    Vh = split(lin(value, raw["wv"], raw["bv"]), Lk)
    energy = jnp.einsum("bhqd,bhkd->bhqk", Qh, Kh) / math.sqrt(hid)
    energy = jnp.where(mask == 0, -10000000000.0, energy)
    attn = jax.nn.softmax(energy, axis=-1)
    x = jnp.einsum("bhqk,bhkd->bhqd", attn, Vh)
    x = x.transpose(0, 2, 1, 3).reshape(B, Lq, hid)
    return lin(x, raw["wo"], raw["bo"]), attn


if __name__ == "__main__":
    B, L, HID, NH = 2, 8, 128, 4
    root = jax.random.PRNGKey(0)
    kp, kq, kk, kv = jax.random.split(root, 4)

    raw = init_params(kp, HID, NH)
    params = prepare_params(raw)

    query = jax.random.normal(kq, (B, L, HID), jnp.float32)
    key_ = jax.random.normal(kk, (B, L, HID), jnp.float32)
    value = jax.random.normal(kv, (B, L, HID), jnp.float32)
    # mask: [B, 1, 1, L], last 2 key positions of batch 1 masked out
    mask = jnp.ones((B, 1, 1, L), jnp.int32).at[1, 0, 0, -2:].set(0)

    # self-attention (fused QKV + stacked-read path)
    out_sa, attn_sa = multi_head_attention(params, query, query, query, mask)
    # cross-attention (separate tiled-linear path)
    out_x, attn_x = multi_head_attention(params, query, key_, value, mask)
    jax.block_until_ready((out_sa, attn_sa, out_x, attn_x))

    assert out_sa.shape == (B, L, HID) and out_x.shape == (B, L, HID)
    assert attn_sa.shape == (B, NH, L, L) and attn_x.shape == (B, NH, L, L)
    assert bool(jnp.all(jnp.isfinite(out_sa))) and bool(jnp.all(jnp.isfinite(out_x)))

    # sanity: probability rows sum to ~1 (approx reciprocal), masked keys ~0
    assert float(jnp.max(jnp.abs(attn_sa.sum(-1) - 1.0))) < 2e-2
    assert float(jnp.max(attn_sa[1, :, :, -2:])) < 1e-6

    # compare against the f32 pure-JAX reference (bf16 MXU tolerances)
    ref_sa, ref_attn_sa = _reference(raw, query, query, query, mask, NH)
    ref_x, ref_attn_x = _reference(raw, query, key_, value, mask, NH)
    assert float(jnp.max(jnp.abs(out_sa - ref_sa))) < 0.15
    assert float(jnp.max(jnp.abs(out_x - ref_x))) < 0.15
    assert float(jnp.max(jnp.abs(attn_sa - ref_attn_sa))) < 0.03
    assert float(jnp.max(jnp.abs(attn_x - ref_attn_x))) < 0.03

    print("KERNEL_OK")
</pallas_src>

<mosaic_0001>
module attributes {stable_mosaic.version = 11 : i64} {
  func.func @_linear_kernel(%arg0: i32, %arg1: i32, %arg2: memref<16x128xf32, #tpu.memory_space<vmem>>, %arg3: memref<128x384xbf16, #tpu.memory_space<vmem>>, %arg4: memref<1x384xf32, #tpu.memory_space<vmem>>, %arg5: memref<16x384xbf16, #tpu.memory_space<vmem>>) attributes {dimension_semantics = [#tpu.dimension_semantics<parallel>, #tpu.dimension_semantics<parallel>], iteration_bounds = array<i64: 1, 1>, scalar_prefetch = 0 : i64, scratch_operands = 0 : i64, tpu.core_type = #tpu.core_type<tc>, window_params = [{transform_indices = @transform_0, window_bounds = array<i64: 16, 128>}, {transform_indices = @transform_1, window_bounds = array<i64: 128, 384>}, {transform_indices = @transform_2, window_bounds = array<i64: 1, 384>}, {transform_indices = @transform_3, window_bounds = array<i64: 16, 384>}]} {
    %c0 = arith.constant 0 : index
    %c0_0 = arith.constant 0 : index
    %0 = vector.load %arg2[%c0, %c0_0] : memref<16x128xf32, #tpu.memory_space<vmem>>, vector<16x128xf32>
    %1 = arith.truncf %0 : vector<16x128xf32> to vector<16x128xbf16>
    %c0_1 = arith.constant 0 : index
    %c0_2 = arith.constant 0 : index
    %2 = vector.load %arg3[%c0_1, %c0_2] : memref<128x384xbf16, #tpu.memory_space<vmem>>, vector<128x384xbf16>
    %cst = arith.constant dense<0.000000e+00> : vector<16x384xf32>
    %3 = tpu.matmul %1, %2, %cst {dimension_numbers = #tpu.dot_dimension_numbers<[1], [0], [0], [1], [0, 0, 1, 1], [], []>} : vector<16x128xbf16>, vector<128x384xbf16>, vector<16x384xf32> -> vector<16x384xf32>
    %c0_3 = arith.constant 0 : index
    %c0_4 = arith.constant 0 : index
    %4 = vector.load %arg4[%c0_3, %c0_4] : memref<1x384xf32, #tpu.memory_space<vmem>>, vector<1x384xf32>
    %5 = vector.broadcast %4 : vector<1x384xf32> to vector<16x384xf32>
    %6 = arith.addf %3, %5 : vector<16x384xf32>
    %7 = arith.truncf %6 : vector<16x384xf32> to vector<16x384xbf16>
    %c0_5 = arith.constant 0 : index
    %c0_6 = arith.constant 0 : index
    %8 = vector.load %arg5[%c0_5, %c0_6] : memref<16x384xbf16, #tpu.memory_space<vmem>>, vector<16x384xbf16>
    tpu.vector_store %arg5[%c0_5, %c0_6], %7 {strides = array<i32>} : memref<16x384xbf16, #tpu.memory_space<vmem>>, vector<16x384xbf16>,
    return
  }
  func.func @transform_0(%arg0: i32, %arg1: i32) -> (i32, i32) {
    %c0_i32 = arith.constant 0 : i32
    %c0_i32_0 = arith.constant 0 : i32
    return %arg1, %c0_i32 : i32, i32
  }
  func.func @transform_1(%arg0: i32, %arg1: i32) -> (i32, i32) {
    %c0_i32 = arith.constant 0 : i32
    %c0_i32_0 = arith.constant 0 : i32
    return %c0_i32, %arg0 : i32, i32
  }
  func.func @transform_2(%arg0: i32, %arg1: i32) -> (i32, i32) {
    %c0_i32 = arith.constant 0 : i32
    %c0_i32_0 = arith.constant 0 : i32
    return %c0_i32, %arg0 : i32, i32
  }
  func.func @transform_3(%arg0: i32, %arg1: i32) -> (i32, i32) {
    %c0_i32 = arith.constant 0 : i32
    return %arg1, %arg0 : i32, i32
  }
}

</mosaic_0001>

<bundles_post_ra>
// kernel: tpu_custom_call.1
= control target key start
LH: loop header
LB: loop body
LE: loop exit
PB: predicated region body
PF: predicated region fallthrough
CT: control target
= control target key end

     0   :  { %8 = vsyncpa [#allocation3], 0  ;;  %s600_s0 = inlined_call_operand.hbm [shape: f32[16,128], index: 0, kind: input, shape index: {}]   ;;  %s601_s1 = inlined_call_operand.hbm [shape: bf16[128,384], index: 1, kind: input, shape index: {}]   ;;  %s602_s2 = inlined_call_operand.vmem [shape: f32[1,384], index: 2, kind: input, shape index: {}]   ;;  %s603_s3 = inlined_call_operand.hbm [shape: bf16[16,384], index: 3, kind: output, shape index: {}]  }
   0x1   :  { %9 = vsyncpa [#allocation6], 0 }
   0x2   :  { %10 = vsyncpa [#allocation4], 0  ;;  %s525_s12 = smov [#allocation2]   ;;  %s453_s16 = scalar_lea.hbm %s600_s0, 256 }
   0x3   :  { %s16_s13 = sshll.u32 %s525_s12, 4  ;;  %p454_p0 = scmp.ne.s32.totalorder %s600_s0, %s453_s16  ;;  %s17_s13 = int_to_ptr.vmem [resolvable:$true] %s16_s13 }
   0x4   :  { %p457_p1 = scmp.lt.u32.totalorder %s453_s16, %s600_s0 }
   0x6   :  { %p459_p2 = pnand %p457_p1, %p454_p0 }
   0x8   :  { %462 = shalt.err (!%p459_p2)
}
   0x9   :  { %s463_s21 = scalar_lea.vmem %s17_s13, 256  ;;  %p468_p4 = scmp.lt.s32.totalorder %s17_s13, %s17_s13 }
   0xa   :  { %p464_p3 = scmp.ne.s32.totalorder %s17_s13, %s463_s21  ;;  %p469_p5 = scmp.lt.s32.totalorder %s463_s21, %s463_s21 }
   0xc   :  { %p470_p6 = por %p469_p5, %p468_p4 }
   0xe   :  { %p471_p7 = pnand %p470_p6, %p464_p3 }
  0x10   :  { %474 = shalt.err (!%p471_p7)
}
  0x11   :  { %s526_s22 = smov 128   ;;  %s527_s23 = smov 8  }
  0x12   :  { %22 = dma.hbm_to_vmem [thread:$0]  %s600_s0, 256, %s17_s13, [#allocation3], %s526_s22, %s526_s22, %s527_s23  }
  0x13   :  { %s528_s26 = smov [#allocation5]   ;;  %s475_s30 = scalar_lea.hbm %s601_s1, 3072 }
  0x14   :  { %s28_s27 = sshll.u32 %s528_s26, 4  ;;  %p476_p8 = scmp.ne.s32.totalorder %s601_s1, %s475_s30  ;;  %s29_s27 = int_to_ptr.vmem [resolvable:$true] %s28_s27 }
  0x15   :  { %p479_p9 = scmp.lt.u32.totalorder %s475_s30, %s601_s1 }
  0x17   :  { %p481_p10 = pnand %p479_p9, %p476_p8 }
  0x19   :  { %484 = shalt.err (!%p481_p10)
}
  0x1a   :  { %s485_s8 = scalar_lea.vmem %s29_s27, 3072  ;;  %p490_p12 = scmp.lt.s32.totalorder %s29_s27, %s29_s27 }
  0x1b   :  { %p486_p11 = scmp.ne.s32.totalorder %s29_s27, %s485_s8  ;;  %p491_p13 = scmp.lt.s32.totalorder %s485_s8, %s485_s8 }
  0x1d   :  { %p492_p0 = por %p491_p13, %p490_p12 }
  0x1f   :  { %p493_p1 = pnand %p492_p0, %p486_p11 }
  0x21   :  { %496 = shalt.err (!%p493_p1)
}
  0x22   :  { %s529_s0 = smov 192   ;;  %s530_s9 = smov 12  }
  0x23   :  { %34 = dma.hbm_to_vmem [thread:$0]  %s601_s1, 3072, %s29_s27, [#allocation6], %s529_s0, %s529_s0, %s530_s9  }
  0x24   :  { %519 = dma.done.wait [#allocation3], 256  }
  0x25   :  { %520 = vsyncadd [#allocation3], 4294967040 }
  0x26   :  { %521 = dma.done.wait [#allocation6], 3072  }
  0x27   :  { %522 = vsyncadd [#allocation6], 4294964224  ;;  %v531_v0 = vmov 0.0   ;;  %vm532_vm0 = vmmov 0   ;;  %v533_v1 = vmov 0   ;;  %v44_v25 = vld [vmem:[#allocation2] sm:$0xff]  ;;  %v81_v29 = vlaneseq }
  0x28   :  { %391 = vmatprep.subr.bf16.mxu1 %v531_v0  ;;  %407 = vmatprep.mubr.msk.bf16.mxu1 %vm532_vm0, %v531_v0  ;;  %v421_v2 = vld [vmem:[#allocation5 + $0x4] ss:$12 sps:$4 sm:$0xff]   ;;  %v423_v3 = vld [vmem:[#allocation5 + $0x8] ss:$12 sps:$4 sm:$0xff]   ;;  %v424_v4 = vld [vmem:[#allocation5] ss:$12 sps:$4 sm:$0xff]  }
  0x29   :  { %256 = vmatprep.mubr.bf16.mxu0 %v533_v1  ;;  %224 = vmatprep.subr.bf16.mxu0 %v421_v2  ;;  %v425_v5 = vld [vmem:[#allocation5 + $0x1c] ss:$12 sps:$4 sm:$0xff]   ;;  %v427_v6 = vld [vmem:[#allocation5 + $0x20] ss:$12 sps:$4 sm:$0xff]   ;;  %v428_v7 = vld [vmem:[#allocation5 + $0x18] ss:$12 sps:$4 sm:$0xff]  }
  0x2a   :  { %392 = vmatpush3.bf16.msra.mxu1 %v423_v3  ;;  %225 = vmatpush1.bf16.msra.mxu0 %v424_v4  ;;  %v429_v8 = vld [vmem:[#allocation5 + $0x34] ss:$12 sps:$4 sm:$0xff]   ;;  %v431_v9 = vld [vmem:[#allocation5 + $0x38] ss:$12 sps:$4 sm:$0xff]   ;;  %v432_v10 = vld [vmem:[#allocation5 + $0x30] ss:$12 sps:$4 sm:$0xff]  }
  0x2b   :  { %393 = vmatprep.subr.bf16.mxu1 %v531_v0  ;;  %226 = vmatprep.subr.bf16.mxu0 %v425_v5  ;;  %v433_v11 = vld [vmem:[#allocation5 + $0x4c] ss:$12 sps:$4 sm:$0xff]   ;;  %v435_v12 = vld [vmem:[#allocation5 + $0x50] ss:$12 sps:$4 sm:$0xff]   ;;  %v436_v13 = vld [vmem:[#allocation5 + $0x48] ss:$12 sps:$4 sm:$0xff]  }
  0x2c   :  { %v437_v14 = vld [vmem:[#allocation5 + $0x64] ss:$12 sps:$4 sm:$0xff]   ;;  %v439_v15 = vld [vmem:[#allocation5 + $0x68] ss:$12 sps:$4 sm:$0xff]   ;;  %v440_v16 = vld [vmem:[#allocation5 + $0x60] ss:$12 sps:$4 sm:$0xff]  }
  0x2d   :  { %v441_v17 = vld [vmem:[#allocation5 + $0x7c] ss:$12 sps:$4 sm:$0xff]   ;;  %v443_v18 = vld [vmem:[#allocation5 + $0x80] ss:$12 sps:$4 sm:$0xff]   ;;  %v444_v19 = vld [vmem:[#allocation5 + $0x78] ss:$12 sps:$4 sm:$0xff]  }
  0x2e   :  { %394 = vmatpush3.bf16.msra.mxu1 %v427_v6  ;;  %227 = vmatpush1.bf16.msra.mxu0 %v428_v7  ;;  %v445_v20 = vld [vmem:[#allocation5 + $0x94] ss:$12 sps:$4 sm:$0xff]   ;;  %v447_v21 = vld [vmem:[#allocation5 + $0x98] ss:$12 sps:$4 sm:$0xff]   ;;  %v448_v22 = vld [vmem:[#allocation5 + $0x90] ss:$12 sps:$4 sm:$0xff]  }
  0x2f   :  { %395 = vmatprep.subr.bf16.mxu1 %v531_v0  ;;  %228 = vmatprep.subr.bf16.mxu0 %v429_v8  ;;  %v449_v23 = vld [vmem:[#allocation5 + $0xac] ss:$12 sps:$4 sm:$0xff]   ;;  %v451_v24 = vld [vmem:[#allocation5 + $0xb0] ss:$12 sps:$4 sm:$0xff]   ;;  %v452_v27 = vld [vmem:[#allocation5 + $0xa8] ss:$12 sps:$4 sm:$0xff]  }
  0x30   :  { %v45_v26 = vld [vmem:[#allocation2 + $0x8] sm:$0xff]  ;;  %v82_v30 = vshrl.u32 %v81_v29, 7  ;;  %v79_v32 = vld [vmem:[%s602_s2] sm:$0x7]  ;;  %s534_s2 = smov [#allocation7]  }
  0x31   :  { %v46_v28 = vpack.c.bf16 %v45_v26, %v44_v25  ;;  %s337_s13 = sshll.u32 %s534_s2, 4  ;;  %s338_s13 = int_to_ptr.vmem [resolvable:$true] %s337_s13 }
  0x32   :  { %396 = vmatpush3.bf16.msra.mxu1 %v431_v9  ;;  %229 = vmatpush1.bf16.msra.mxu0 %v432_v10  ;;  %v91_v31 = vsub.s32 2, %v82_v30  ;;  %v83_v33 = vsub.s32 0, %v82_v30  ;;  %v87_v34 = vsub.s32 1, %v82_v30  ;;  %s497_s14 = scalar_lea.vmem %s338_s13, 384  ;;  %p502_p3 = scmp.lt.s32.totalorder %s338_s13, %s338_s13 }
  0x33   :  { %397 = vmatprep.subr.bf16.mxu1 %v531_v0  ;;  %230 = vmatprep.subr.bf16.mxu0 %v433_v11  ;;  %p498_p2 = scmp.ne.s32.totalorder %s338_s13, %s497_s14  ;;  %p503_p4 = scmp.lt.s32.totalorder %s497_s14, %s497_s14 }
  0x34   :  { %v92_v35 = vrot.slane %v79_v32, %v91_v31  ;;  %v84_v36 = vrot.slane %v79_v32, %v83_v33  ;;  %v88_v37 = vrot.slane %v79_v32, %v87_v34 }
  0x35   :  { %p504_p5 = por %p503_p4, %p502_p3 }
  0x36   :  { %398 = vmatpush3.bf16.msra.mxu1 %v435_v12  ;;  %231 = vmatpush1.bf16.msra.mxu0 %v436_v13 }
  0x37   :  { %399 = vmatprep.subr.bf16.mxu1 %v531_v0  ;;  %232 = vmatprep.subr.bf16.mxu0 %v437_v14  ;;  %p505_p6 = pnand %p504_p5, %p498_p2 }
  0x3a   :  { %400 = vmatpush3.bf16.msra.mxu1 %v439_v15  ;;  %233 = vmatpush1.bf16.msra.mxu0 %v440_v16 }
  0x3b   :  { %401 = vmatprep.subr.bf16.mxu1 %v531_v0  ;;  %234 = vmatprep.subr.bf16.mxu0 %v441_v17 }
  0x3e   :  { %402 = vmatpush3.bf16.msra.mxu1 %v443_v18  ;;  %235 = vmatpush1.bf16.msra.mxu0 %v444_v19 }
  0x3f   :  { %403 = vmatprep.subr.bf16.mxu1 %v531_v0  ;;  %236 = vmatprep.subr.bf16.mxu0 %v445_v20 }
  0x42   :  { %404 = vmatpush3.bf16.msra.mxu1 %v447_v21  ;;  %237 = vmatpush1.bf16.msra.mxu0 %v448_v22 }
  0x43   :  { %405 = vmatprep.subr.bf16.mxu1 %v531_v0  ;;  %238 = vmatprep.subr.bf16.mxu0 %v449_v23 }
  0x46   :  { %406 = vmatpush3.bf16.msra.mxu1 %v451_v24  ;;  %239 = vmatpush1.bf16.msra.mxu0 %v452_v27 }
  0x49   :  { %408 = vmatmul.mubr.bf16.vlgmr.msra.gmra.mrb[0].mxu1 %v46_v28  ;;  %257 = vmatmul.mubr.bf16.vlgmr.msra.gmra.mrb[0].mxu0 %v46_v28 }
 0x11c   :  { %v301_v38 = vpop.f32.mrb[0].mxu1  ;;  %v258_v40 = vpop.f32.mrb[0].mxu0 }
 0x11d   :  { %v302_v39 = vadd.f32 %v301_v38, %v92_v35  ;;  %v409_v41 = vpop.f32.mrb[1].mxu1  ;;  %v259_v42 = vadd.f32 %v258_v40, %v84_v36  ;;  %v260_v43 = vpop.f32.mrb[1].mxu0 }
 0x11e   :  { %v304_v44 = vpop.f32.mrb[2].mxu1  ;;  %v261_v46 = vadd.f32 %v260_v43, %v88_v37  ;;  %v262_v48 = vpop.f32.mrb[2].mxu0 }
 0x11f   :  { %v379_v45 = vpack.c.bf16 %v302_v39, %v302_v39  ;;  %v305_v47 = vadd.f32 %v304_v44, %v92_v35  ;;  %v410_v49 = vpop.f32.mrb[3].mxu1  ;;  %v263_v50 = vadd.f32 %v262_v48, %v84_v36  ;;  %v264_v51 = vpop.f32.mrb[3].mxu0 }
 0x120   :  { %v378_v52 = vpack.c.bf16 %v261_v46, %v259_v42  ;;  %v265_v54 = vadd.f32 %v264_v51, %v88_v37 }
 0x121   :  { %329 = vst [vmem:[#allocation7 + $0x8] sm:$0xf] %v379_v45  ;;  %v381_v53 = vpack.c.bf16 %v305_v47, %v305_v47 }
 0x122   :  { %328 = vst [vmem:[#allocation7] sm:$0xff] %v378_v52  ;;  %v380_v55 = vpack.c.bf16 %v265_v54, %v263_v50 }
 0x123   :  { %331 = vst [vmem:[#allocation7 + $0x14] sm:$0xf] %v381_v53 }
 0x124   :  { %330 = vst [vmem:[#allocation7 + $0xc] sm:$0xff] %v380_v55 }
 0x125   :  { %508 = shalt.err (!%p505_p6)
}
 0x126   :  { %s509_s17 = scalar_lea.hbm %s603_s3, 384 }
 0x127   :  { %p510_p7 = scmp.ne.s32.totalorder %s603_s3, %s509_s17  ;;  %p513_p8 = scmp.lt.u32.totalorder %s509_s17, %s603_s3 }
 0x129   :  { %p515_p9 = pnand %p513_p8, %p510_p7 }
 0x12b   :  { %518 = shalt.err (!%p515_p9)
}
 0x12c   :  { %343 = dma.vmem_to_hbm [thread:$0]  %s338_s13, 384, %s603_s3, [#allocation4], %s529_s0, %s529_s0, %s530_s9  }
 0x12d   :  { %523 = dma.done.wait [#allocation4], 384  }
 0x12e   :  { %524 = vsyncadd [#allocation4], 4294966912 }
 0x12f   :  { %347 = vsyncpa [#allocation3], 1 }
 0x130   :  { %348 = vsyncpa [#allocation6], 1 }
 0x131   :  { %349 = vsyncpa [#allocation4], 1 }

</bundles_post_ra>
